<compile_context>
chip_gen: v6e
topology: v6e:2x2x1
jax: 0.10.0
libtpu: 0.0.40
codegen_flags: <defaults>
</compile_context>

<pallas_src>
import jax
import jax.numpy as jnp
from jax.experimental import pallas as pl
from jax.experimental.pallas import tpu as pltpu


# ----------------------------- in-kernel helpers -----------------------------

def _layer_norm(x, gamma, beta, eps=1e-5):
    mu = jnp.mean(x, axis=-1, keepdims=True)
    var = jnp.mean((x - mu) ** 2, axis=-1, keepdims=True)
    return (x - mu) * jax.lax.rsqrt(var + eps) * gamma + beta


def _gelu_exact(x):
    # PyTorch nn.GELU() default: 0.5 * x * (1 + erf(x / sqrt(2)))
    return 0.5 * x * (1.0 + jax.lax.erf(x * (1.0 / jnp.sqrt(2.0))))


# --------------------------------- kernel ------------------------------------

def pid_weighting_kernel(
    x_ref,
    w1_ref, b1_ref, g1_ref, be1_ref,
    w2_ref, b2_ref, g2_ref, be2_ref,
    wh_ref, bh_ref,
    out_ref,
):
    # Cast to bf16 inside the kernel (no wrapper-side HBM round trip).
    x = x_ref[...].astype(w1_ref.dtype)

    # ---- question_analyzer: Linear -> LayerNorm -> GELU -> Linear -> LayerNorm
    h1 = jnp.dot(x, w1_ref[...], preferred_element_type=jnp.float32) + b1_ref[...]
    h1 = _layer_norm(h1, g1_ref[...], be1_ref[...])
    h1 = _gelu_exact(h1)

    qc = jnp.dot(h1.astype(w2_ref.dtype), w2_ref[...],
                 preferred_element_type=jnp.float32) + b2_ref[...]
    qc = _layer_norm(qc, g2_ref[...], be2_ref[...])

    # ---- fused heads: single [h4, 10] matmul, packed column order
    #      [r0, u0, u1, u2, s0, s1, s2, r3, r1, r2]
    z = jnp.dot(qc.astype(wh_ref.dtype), wh_ref[...],
                preferred_element_type=jnp.float32) + bh_ref[...]      # [TB, 10] f32

    lane = jax.lax.broadcasted_iota(jnp.int32, z.shape, 1)
    is_uniq = (lane >= 1) & (lane <= 3)
    is_syn = (lane >= 4) & (lane <= 6)
    is_router = jnp.logical_not(is_uniq | is_syn)                      # lanes 0,7,8,9

    # ---- fused 3-group softmax: one exp pass, per-group max / sum / recip.
    neg = jnp.float32(-1e30)   # keep softmax math in f32 (bf16 would overflow)
    m_r = jnp.max(jnp.where(is_router, z, neg), axis=-1, keepdims=True)
    m_u = jnp.max(jnp.where(is_uniq, z, neg), axis=-1, keepdims=True)
    m_s = jnp.max(jnp.where(is_syn, z, neg), axis=-1, keepdims=True)
    gmax = jnp.where(is_uniq, m_u, jnp.where(is_syn, m_s, m_r))
    e = jnp.exp(z - gmax)                                              # single EUP pass
    sum_r = jnp.sum(jnp.where(is_router, e, 0.0), axis=-1, keepdims=True)
    sum_u = jnp.sum(jnp.where(is_uniq, e, 0.0), axis=-1, keepdims=True)
    sum_s = jnp.sum(jnp.where(is_syn, e, 0.0), axis=-1, keepdims=True)
    inv_r = pl.reciprocal(sum_r)     # exact recip: rows sum to 1 to f32 precision
    inv_u = pl.reciprocal(sum_u)
    inv_s = pl.reciprocal(sum_s)

    # Hierarchical composition folded into one per-lane scale:
    #   router lanes (0,7): softmax            -> scale = inv_r
    #   uniq lanes (1..3):  w_uniq * uniq-dist -> scale = inv_u * e[:,8]*inv_r
    #   syn  lanes (4..6):  w_syn  * syn-dist  -> scale = inv_s * e[:,9]*inv_r
    w_u = e[:, 8:9] * inv_r
    w_s = e[:, 9:10] * inv_r
    scale = jnp.where(is_uniq, inv_u * w_u, jnp.where(is_syn, inv_s * w_s, inv_r))

    # Columns 0..7 are already in the final output order:
    # [w_red, w_T_uniq, w_V_uniq, w_P_uniq, w_TV_syn, w_PV_syn, w_PT_syn, w_higher]
    out_ref[...] = (e * scale)[:, :8].astype(out_ref.dtype)
    # TODO(synk): lane-dense (TB,8)->(TB/16,128) output repack skipped — needs a
    # sublane->lane relayout whose Mosaic lowering is not guaranteed across versions.


# --------------------------------- wrapper -----------------------------------

def _round_up(x, m):
    return ((x + m - 1) // m) * m


def _cdiv(a, b):
    return (a + b - 1) // b


def _tpu_vmem_bytes():
    try:
        return int(pltpu.get_tpu_info().vmem_capacity_bytes)
    except Exception:
        return 64 << 20  # conservative fallback (v7x-sized)


def _derive_tile(B, H, x_itemsize, x_buffers):
    """Byte-derived, H-aware batch tile + scoped-VMEM limit."""
    vmem = _tpu_vmem_bytes()
    two_cores = vmem <= (64 << 20)                 # v7x-class TC: 64 MiB, 2 TC/chip
    limit = (48 << 20) if two_cores else (100 << 20)

    h2, h4 = max(H // 2, 1), max(H // 4, 1)

    def ru(v, m):
        return _round_up(v, m)

    def pad2d(r, c, isz):                          # (8,128)-padded VMEM footprint
        return ru(r, 8) * ru(c, 128) * isz

    # Resident params (constant index_map); assume Pallas double-buffers them.
    resident = 2 * (pad2d(H, h2, 2) + pad2d(h2, h4, 2) + pad2d(h4, 10, 2)
                    + 4 * pad2d(1, h2, 4) + 3 * pad2d(1, h4, 4) + pad2d(1, 10, 4))

    # Per-batch-row pipeline bytes: streamed x tiles, in-kernel bf16 copy,
    # f32 intermediates (h1/LN/GELU, qc/LN), 10-lane tail temps, out buffers.
    per_row = (x_buffers * ru(H, 128) * x_itemsize
               + ru(H, 128) * 2
               + 3 * ru(h2, 128) * 4
               + 2 * ru(h4, 128) * 4
               + 6 * 128 * 4)

    headroom = 4 << 20                             # Mosaic internal scratch etc.
    budget = max(limit - resident - headroom, 1 << 20)
    tb = int(0.7 * budget) // per_row
    tb = max(8, (tb // 8) * 8)
    tb = min(tb, 32768)                            # amortizes ~0.35us/step overhead
    tb = min(tb, _round_up(B, 8))                  # never larger than needed
    if two_cores and B > 8:
        # Keep >= 2 grid steps so both TensorCores get work under "parallel".
        tb = min(tb, _round_up(_cdiv(B, 2), 8))
    return limit, tb


def _x_map(i):
    return (i, 0)


def _out_map(i):
    return (i, 0)


def _resident_map(i):
    # Parameters: same block every grid step -> stays resident in VMEM.
    return (0, 0)


def pack_params(params, mm_dtype=jnp.bfloat16):
    """One-time packing of module parameters into kernel-ready arrays.

    The three head projections are packed into a single [h4, 10] weight with
    column order [r0, u0, u1, u2, s0, s1, s2, r3, r1, r2] so the kernel issues
    one MXU matmul and columns 0..7 land in the final output order.
    """
    wr, wu, ws = params["wr"], params["wu"], params["ws"]
    br, bu, bs = params["br"], params["bu"], params["bs"]
    w_heads = jnp.concatenate(
        [wr[:, 0:1], wu, ws, wr[:, 3:4], wr[:, 1:2], wr[:, 2:3]], axis=1)
    b_heads = jnp.concatenate(
        [br[0:1], bu, bs, br[3:4], br[1:2], br[2:3]], axis=0)
    f32 = jnp.float32
    return dict(
        w1=params["w1"].astype(mm_dtype), b1=params["b1"][None, :].astype(f32),
        g1=params["g1"][None, :].astype(f32), be1=params["be1"][None, :].astype(f32),
        w2=params["w2"].astype(mm_dtype), b2=params["b2"][None, :].astype(f32),
        g2=params["g2"][None, :].astype(f32), be2=params["be2"][None, :].astype(f32),
        wh=w_heads.astype(mm_dtype), bh=b_heads[None, :].astype(f32),
    )


def hierarchical_pid_weighting(lang_global, packed, *, block_b=None,
                               vmem_limit_bytes=None, x_buffers=2):
    """Forward pass. `packed` comes from pack_params(); x stays in its own dtype."""
    B, H = lang_global.shape
    limit, tb = _derive_tile(B, H, lang_global.dtype.itemsize, x_buffers)
    if block_b is not None:
        tb = max(8, _round_up(min(block_b, _round_up(B, 8)), 8))
    if vmem_limit_bytes is None:
        vmem_limit_bytes = limit
    nb = _cdiv(B, tb)

    args = (
        lang_global,
        packed["w1"], packed["b1"], packed["g1"], packed["be1"],
        packed["w2"], packed["b2"], packed["g2"], packed["be2"],
        packed["wh"], packed["bh"],
    )

    x_spec_kwargs = {}
    if x_buffers != 2:
        # Opt-in deeper buffering on the one streamed input (review item 10).
        x_spec_kwargs["pipeline_mode"] = pl.Buffered(x_buffers)
    in_specs = [pl.BlockSpec((tb, H), _x_map, **x_spec_kwargs)]
    in_specs += [pl.BlockSpec(a.shape, _resident_map) for a in args[1:]]

    return pl.pallas_call(
        pid_weighting_kernel,
        out_shape=jax.ShapeDtypeStruct((B, 8), jnp.float32),
        grid=(nb,),
        in_specs=in_specs,
        out_specs=pl.BlockSpec((tb, 8), _out_map),
        compiler_params=pltpu.CompilerParams(
            dimension_semantics=("parallel",),
            vmem_limit_bytes=vmem_limit_bytes,
        ),
    )(*args)


# ------------------------- parameter init / reference ------------------------

def init_params(key, hidden_dim):
    h2 = hidden_dim // 2
    h4 = hidden_dim // 4
    keys = jax.random.split(key, 10)
    scale = 0.05
    return {
        # question_analyzer
        "w1": scale * jax.random.normal(keys[0], (hidden_dim, h2), jnp.float32),
        "b1": scale * jax.random.normal(keys[1], (h2,), jnp.float32),
        "g1": jnp.ones((h2,), jnp.float32),
        "be1": jnp.zeros((h2,), jnp.float32),
        "w2": scale * jax.random.normal(keys[2], (h2, h4), jnp.float32),
        "b2": scale * jax.random.normal(keys[3], (h4,), jnp.float32),
        "g2": jnp.ones((h4,), jnp.float32),
        "be2": jnp.zeros((h4,), jnp.float32),
        # high_level_router
        "wr": scale * jax.random.normal(keys[4], (h4, 4), jnp.float32),
        "br": scale * jax.random.normal(keys[5], (4,), jnp.float32),
        # uniqueness_decomposer
        "wu": scale * jax.random.normal(keys[6], (h4, 3), jnp.float32),
        "bu": scale * jax.random.normal(keys[7], (3,), jnp.float32),
        # synergy_decomposer
        "ws": scale * jax.random.normal(keys[8], (h4, 3), jnp.float32),
        "bs": scale * jax.random.normal(keys[9], (3,), jnp.float32),
    }


def reference_forward(x, p):
    h1 = x @ p["w1"] + p["b1"]
    mu = h1.mean(-1, keepdims=True)
    var = ((h1 - mu) ** 2).mean(-1, keepdims=True)
    h1 = (h1 - mu) / jnp.sqrt(var + 1e-5) * p["g1"] + p["be1"]
    h1 = jax.nn.gelu(h1, approximate=False)
    qc = h1 @ p["w2"] + p["b2"]
    mu = qc.mean(-1, keepdims=True)
    var = ((qc - mu) ** 2).mean(-1, keepdims=True)
    qc = (qc - mu) / jnp.sqrt(var + 1e-5) * p["g2"] + p["be2"]
    hl = jax.nn.softmax(qc @ p["wr"] + p["br"], axis=-1)
    ud = jax.nn.softmax(qc @ p["wu"] + p["bu"], axis=-1)
    sd = jax.nn.softmax(qc @ p["ws"] + p["bs"], axis=-1)
    w_r, w_u, w_s, w_h = hl[:, 0:1], hl[:, 1:2], hl[:, 2:3], hl[:, 3:4]
    return jnp.concatenate(
        [w_r, w_u * ud[:, 0:1], w_u * ud[:, 1:2], w_u * ud[:, 2:3],
         w_s * sd[:, 0:1], w_s * sd[:, 1:2], w_s * sd[:, 2:3], w_h],
        axis=1,
    )


# ----------------------------------- main -------------------------------------

if __name__ == "__main__":
    HIDDEN = 32  # small shape consistent with the module (hidden % 4 == 0)
    key = jax.random.PRNGKey(0)
    k_x, k_p = jax.random.split(key)
    params = init_params(k_p, HIDDEN)
    packed = pack_params(params)   # head packing / reshapes hoisted out of the call

    # bf16 MXU operands => compare with a loose tolerance; also verify the
    # structural invariant sum(components) == 1 (exact softmax normalization).
    def _check(B, **kw):
        x = jax.random.normal(jax.random.fold_in(k_x, B), (B, HIDDEN), jnp.float32)
        out = jax.block_until_ready(hierarchical_pid_weighting(x, packed, **kw))
        ref = reference_forward(x, params)
        assert out.shape == (B, 8)
        assert jnp.allclose(out, ref, atol=1e-2, rtol=1e-2), (out, ref)
        assert jnp.allclose(out.sum(axis=-1), 1.0, atol=2e-3)
        return out

    _check(2)                       # single partial tile (B < 8): ragged masking path
    _check(37, block_b=16)          # multi-step grid + ragged last tile
    _check(256)                     # byte-derived tile path

    print("KERNEL_OK")
</pallas_src>

<mosaic_0001>
module attributes {stable_mosaic.version = 11 : i64} {
  func.func @pid_weighting_kernel(%arg0: i32, %arg1: memref<8x32xf32, #tpu.memory_space<vmem>>, %arg2: memref<32x16xbf16, #tpu.memory_space<vmem>>, %arg3: memref<1x16xf32, #tpu.memory_space<vmem>>, %arg4: memref<1x16xf32, #tpu.memory_space<vmem>>, %arg5: memref<1x16xf32, #tpu.memory_space<vmem>>, %arg6: memref<16x8xbf16, #tpu.memory_space<vmem>>, %arg7: memref<1x8xf32, #tpu.memory_space<vmem>>, %arg8: memref<1x8xf32, #tpu.memory_space<vmem>>, %arg9: memref<1x8xf32, #tpu.memory_space<vmem>>, %arg10: memref<8x10xbf16, #tpu.memory_space<vmem>>, %arg11: memref<1x10xf32, #tpu.memory_space<vmem>>, %arg12: memref<8x8xf32, #tpu.memory_space<vmem>>) attributes {dimension_semantics = [#tpu.dimension_semantics<parallel>], iteration_bounds = array<i64: 1>, scalar_prefetch = 0 : i64, scratch_operands = 0 : i64, tpu.core_type = #tpu.core_type<tc>, window_params = [{transform_indices = @transform_0, window_bounds = array<i64: 8, 32>}, {pipeline_mode = #tpu.pipeline_mode<synchronous>, transform_indices = @transform_1, window_bounds = array<i64: 32, 16>}, {pipeline_mode = #tpu.pipeline_mode<synchronous>, transform_indices = @transform_2, window_bounds = array<i64: 1, 16>}, {pipeline_mode = #tpu.pipeline_mode<synchronous>, transform_indices = @transform_3, window_bounds = array<i64: 1, 16>}, {pipeline_mode = #tpu.pipeline_mode<synchronous>, transform_indices = @transform_4, window_bounds = array<i64: 1, 16>}, {pipeline_mode = #tpu.pipeline_mode<synchronous>, transform_indices = @transform_5, window_bounds = array<i64: 16, 8>}, {pipeline_mode = #tpu.pipeline_mode<synchronous>, transform_indices = @transform_6, window_bounds = array<i64: 1, 8>}, {pipeline_mode = #tpu.pipeline_mode<synchronous>, transform_indices = @transform_7, window_bounds = array<i64: 1, 8>}, {pipeline_mode = #tpu.pipeline_mode<synchronous>, transform_indices = @transform_8, window_bounds = array<i64: 1, 8>}, {pipeline_mode = #tpu.pipeline_mode<synchronous>, transform_indices = @transform_9, window_bounds = array<i64: 8, 10>}, {pipeline_mode = #tpu.pipeline_mode<synchronous>, transform_indices = @transform_10, window_bounds = array<i64: 1, 10>}, {transform_indices = @transform_11, window_bounds = array<i64: 8, 8>}]} {
    %c0 = arith.constant 0 : index
    %c0_0 = arith.constant 0 : index
    %0 = vector.load %arg1[%c0, %c0_0] : memref<8x32xf32, #tpu.memory_space<vmem>>, vector<8x32xf32>
    %1 = arith.truncf %0 : vector<8x32xf32> to vector<8x32xbf16>
    %c0_1 = arith.constant 0 : index
    %c0_2 = arith.constant 0 : index
    %2 = vector.load %arg2[%c0_1, %c0_2] : memref<32x16xbf16, #tpu.memory_space<vmem>>, vector<32x16xbf16>
    %cst = arith.constant dense<0.000000e+00> : vector<8x16xf32>
    %3 = tpu.matmul %1, %2, %cst {dimension_numbers = #tpu.dot_dimension_numbers<[1], [0], [0], [1], [0, 0, 1, 1], [], []>} : vector<8x32xbf16>, vector<32x16xbf16>, vector<8x16xf32> -> vector<8x16xf32>
    %c0_3 = arith.constant 0 : index
    %c0_4 = arith.constant 0 : index
    %4 = vector.load %arg3[%c0_3, %c0_4] : memref<1x16xf32, #tpu.memory_space<vmem>>, vector<1x16xf32>
    %5 = vector.broadcast %4 : vector<1x16xf32> to vector<8x16xf32>
    %6 = arith.addf %3, %5 : vector<8x16xf32>
    %c0_5 = arith.constant 0 : index
    %c0_6 = arith.constant 0 : index
    %7 = vector.load %arg4[%c0_5, %c0_6] : memref<1x16xf32, #tpu.memory_space<vmem>>, vector<1x16xf32>
    %c0_7 = arith.constant 0 : index
    %c0_8 = arith.constant 0 : index
    %8 = vector.load %arg5[%c0_7, %c0_8] : memref<1x16xf32, #tpu.memory_space<vmem>>, vector<1x16xf32>
    %cst_9 = arith.constant dense<0.000000e+00> : vector<8xf32>
    %9 = vector.multi_reduction <add>, %6, %cst_9 [1] : vector<8x16xf32> to vector<8xf32>
    %10 = vector.shape_cast %9 : vector<8xf32> to vector<8x1xf32>
    %cst_10 = arith.constant 1.600000e+01 : f32
    %11 = vector.broadcast %cst_10 : f32 to vector<8x1xf32>
    %12 = arith.divf %10, %11 : vector<8x1xf32>
    %13 = vector.broadcast %12 : vector<8x1xf32> to vector<8x16xf32>
    %14 = arith.subf %6, %13 : vector<8x16xf32>
    %15 = arith.mulf %14, %14 : vector<8x16xf32>
    %cst_11 = arith.constant dense<0.000000e+00> : vector<8xf32>
    %16 = vector.multi_reduction <add>, %15, %cst_11 [1] : vector<8x16xf32> to vector<8xf32>
    %17 = vector.shape_cast %16 : vector<8xf32> to vector<8x1xf32>
    %cst_12 = arith.constant 1.600000e+01 : f32
    %18 = vector.broadcast %cst_12 : f32 to vector<8x1xf32>
    %19 = arith.divf %17, %18 : vector<8x1xf32>
    %20 = vector.broadcast %12 : vector<8x1xf32> to vector<8x16xf32>
    %21 = arith.subf %6, %20 : vector<8x16xf32>
    %cst_13 = arith.constant 9.99999974E-6 : f32
    %22 = vector.broadcast %cst_13 : f32 to vector<8x1xf32>
    %23 = arith.addf %19, %22 : vector<8x1xf32>
    %24 = math.rsqrt %23 : vector<8x1xf32>
    %25 = vector.broadcast %24 : vector<8x1xf32> to vector<8x16xf32>
    %26 = arith.mulf %21, %25 : vector<8x16xf32>
    %27 = vector.broadcast %7 : vector<1x16xf32> to vector<8x16xf32>
    %28 = arith.mulf %26, %27 : vector<8x16xf32>
    %29 = vector.broadcast %8 : vector<1x16xf32> to vector<8x16xf32>
    %30 = arith.addf %28, %29 : vector<8x16xf32>
    %cst_14 = arith.constant 5.000000e-01 : f32
    %31 = vector.broadcast %cst_14 : f32 to vector<8x16xf32>
    %32 = arith.mulf %31, %30 : vector<8x16xf32>
    %cst_15 = arith.constant 2.000000e+00 : f32
    %33 = math.sqrt %cst_15 : f32
    %cst_16 = arith.constant 1.000000e+00 : f32
    %34 = arith.divf %cst_16, %33 : f32
    %35 = vector.broadcast %34 : f32 to vector<8x16xf32>
    %36 = arith.mulf %30, %35 : vector<8x16xf32>
    %37 = math.erf %36 : vector<8x16xf32>
    %cst_17 = arith.constant 1.000000e+00 : f32
    %38 = vector.broadcast %cst_17 : f32 to vector<8x16xf32>
    %39 = arith.addf %38, %37 : vector<8x16xf32>
    %40 = arith.mulf %32, %39 : vector<8x16xf32>
    %41 = arith.truncf %40 : vector<8x16xf32> to vector<8x16xbf16>
    %c0_18 = arith.constant 0 : index
    %c0_19 = arith.constant 0 : index
    %42 = vector.load %arg6[%c0_18, %c0_19] : memref<16x8xbf16, #tpu.memory_space<vmem>>, vector<16x8xbf16>
    %cst_20 = arith.constant dense<0.000000e+00> : vector<8x8xf32>
    %43 = tpu.matmul %41, %42, %cst_20 {dimension_numbers = #tpu.dot_dimension_numbers<[1], [0], [0], [1], [0, 0, 1, 1], [], []>} : vector<8x16xbf16>, vector<16x8xbf16>, vector<8x8xf32> -> vector<8x8xf32>
    %c0_21 = arith.constant 0 : index
    %c0_22 = arith.constant 0 : index
    %44 = vector.load %arg7[%c0_21, %c0_22] : memref<1x8xf32, #tpu.memory_space<vmem>>, vector<1x8xf32>
    %45 = vector.broadcast %44 : vector<1x8xf32> to vector<8x8xf32>
    %46 = arith.addf %43, %45 : vector<8x8xf32>
    %c0_23 = arith.constant 0 : index
    %c0_24 = arith.constant 0 : index
    %47 = vector.load %arg8[%c0_23, %c0_24] : memref<1x8xf32, #tpu.memory_space<vmem>>, vector<1x8xf32>
    %c0_25 = arith.constant 0 : index
    %c0_26 = arith.constant 0 : index
    %48 = vector.load %arg9[%c0_25, %c0_26] : memref<1x8xf32, #tpu.memory_space<vmem>>, vector<1x8xf32>
    %cst_27 = arith.constant dense<0.000000e+00> : vector<8xf32>
    %49 = vector.multi_reduction <add>, %46, %cst_27 [1] : vector<8x8xf32> to vector<8xf32>
    %50 = vector.shape_cast %49 : vector<8xf32> to vector<8x1xf32>
    %cst_28 = arith.constant 8.000000e+00 : f32
    %51 = vector.broadcast %cst_28 : f32 to vector<8x1xf32>
    %52 = arith.divf %50, %51 : vector<8x1xf32>
    %53 = vector.broadcast %52 : vector<8x1xf32> to vector<8x8xf32>
    %54 = arith.subf %46, %53 : vector<8x8xf32>
    %55 = arith.mulf %54, %54 : vector<8x8xf32>
    %cst_29 = arith.constant dense<0.000000e+00> : vector<8xf32>
    %56 = vector.multi_reduction <add>, %55, %cst_29 [1] : vector<8x8xf32> to vector<8xf32>
    %57 = vector.shape_cast %56 : vector<8xf32> to vector<8x1xf32>
    %cst_30 = arith.constant 8.000000e+00 : f32
    %58 = vector.broadcast %cst_30 : f32 to vector<8x1xf32>
    %59 = arith.divf %57, %58 : vector<8x1xf32>
    %60 = vector.broadcast %52 : vector<8x1xf32> to vector<8x8xf32>
    %61 = arith.subf %46, %60 : vector<8x8xf32>
    %cst_31 = arith.constant 9.99999974E-6 : f32
    %62 = vector.broadcast %cst_31 : f32 to vector<8x1xf32>
    %63 = arith.addf %59, %62 : vector<8x1xf32>
    %64 = math.rsqrt %63 : vector<8x1xf32>
    %65 = vector.broadcast %64 : vector<8x1xf32> to vector<8x8xf32>
    %66 = arith.mulf %61, %65 : vector<8x8xf32>
    %67 = vector.broadcast %47 : vector<1x8xf32> to vector<8x8xf32>
    %68 = arith.mulf %66, %67 : vector<8x8xf32>
    %69 = vector.broadcast %48 : vector<1x8xf32> to vector<8x8xf32>
    %70 = arith.addf %68, %69 : vector<8x8xf32>
    %71 = arith.truncf %70 : vector<8x8xf32> to vector<8x8xbf16>
    %c0_32 = arith.constant 0 : index
    %c0_33 = arith.constant 0 : index
    %72 = vector.load %arg10[%c0_32, %c0_33] : memref<8x10xbf16, #tpu.memory_space<vmem>>, vector<8x10xbf16>
    %cst_34 = arith.constant dense<0.000000e+00> : vector<8x10xf32>
    %73 = tpu.matmul %71, %72, %cst_34 {dimension_numbers = #tpu.dot_dimension_numbers<[1], [0], [0], [1], [0, 0, 1, 1], [], []>} : vector<8x8xbf16>, vector<8x10xbf16>, vector<8x10xf32> -> vector<8x10xf32>
    %c0_35 = arith.constant 0 : index
    %c0_36 = arith.constant 0 : index
    %74 = vector.load %arg11[%c0_35, %c0_36] : memref<1x10xf32, #tpu.memory_space<vmem>>, vector<1x10xf32>
    %75 = vector.broadcast %74 : vector<1x10xf32> to vector<8x10xf32>
    %76 = arith.addf %73, %75 : vector<8x10xf32>
    %77 = tpu.iota {dimensions = array<i32: 1>} : vector<8x10xi32>
    %c1_i32 = arith.constant 1 : i32
    %78 = vector.broadcast %c1_i32 : i32 to vector<8x10xi32>
    %79 = arith.cmpi sge, %77, %78 : vector<8x10xi32>
    %c3_i32 = arith.constant 3 : i32
    %80 = vector.broadcast %c3_i32 : i32 to vector<8x10xi32>
    %81 = arith.cmpi sle, %77, %80 : vector<8x10xi32>
    %82 = arith.andi %79, %81 : vector<8x10xi1>
    %c4_i32 = arith.constant 4 : i32
    %83 = vector.broadcast %c4_i32 : i32 to vector<8x10xi32>
    %84 = arith.cmpi sge, %77, %83 : vector<8x10xi32>
    %c6_i32 = arith.constant 6 : i32
    %85 = vector.broadcast %c6_i32 : i32 to vector<8x10xi32>
    %86 = arith.cmpi sle, %77, %85 : vector<8x10xi32>
    %87 = arith.andi %84, %86 : vector<8x10xi1>
    %88 = arith.ori %82, %87 : vector<8x10xi1>
    %cst_37 = arith.constant dense<true> : vector<8x10xi1>
    %89 = arith.xori %88, %cst_37 : vector<8x10xi1>
    %cst_38 = arith.constant -1.000000e+30 : f32
    %90 = vector.broadcast %cst_38 : f32 to vector<8x10xf32>
    %91 = arith.select %89, %76, %90 : vector<8x10xi1>, vector<8x10xf32>
    %cst_39 = arith.constant dense<0xFF800000> : vector<8xf32>
    %92 = vector.multi_reduction <maximumf>, %91, %cst_39 [1] : vector<8x10xf32> to vector<8xf32>
    %93 = vector.shape_cast %92 : vector<8xf32> to vector<8x1xf32>
    %cst_40 = arith.constant -1.000000e+30 : f32
    %94 = vector.broadcast %cst_40 : f32 to vector<8x10xf32>
    %95 = arith.select %82, %76, %94 : vector<8x10xi1>, vector<8x10xf32>
    %cst_41 = arith.constant dense<0xFF800000> : vector<8xf32>
    %96 = vector.multi_reduction <maximumf>, %95, %cst_41 [1] : vector<8x10xf32> to vector<8xf32>
    %97 = vector.shape_cast %96 : vector<8xf32> to vector<8x1xf32>
    %cst_42 = arith.constant -1.000000e+30 : f32
    %98 = vector.broadcast %cst_42 : f32 to vector<8x10xf32>
    %99 = arith.select %87, %76, %98 : vector<8x10xi1>, vector<8x10xf32>
    %cst_43 = arith.constant dense<0xFF800000> : vector<8xf32>
    %100 = vector.multi_reduction <maximumf>, %99, %cst_43 [1] : vector<8x10xf32> to vector<8xf32>
    %101 = vector.shape_cast %100 : vector<8xf32> to vector<8x1xf32>
    %102 = vector.shape_cast %101 : vector<8x1xf32> to vector<8x1xf32>
    %103 = vector.broadcast %102 : vector<8x1xf32> to vector<8x10xf32>
    %104 = vector.shape_cast %93 : vector<8x1xf32> to vector<8x1xf32>
    %105 = vector.broadcast %104 : vector<8x1xf32> to vector<8x10xf32>
    %106 = arith.select %87, %103, %105 : vector<8x10xi1>, vector<8x10xf32>
    %107 = vector.shape_cast %97 : vector<8x1xf32> to vector<8x1xf32>
    %108 = vector.broadcast %107 : vector<8x1xf32> to vector<8x10xf32>
    %109 = arith.select %82, %108, %106 : vector<8x10xi1>, vector<8x10xf32>
    %110 = arith.subf %76, %109 : vector<8x10xf32>
    %111 = math.exp %110 : vector<8x10xf32>
    %cst_44 = arith.constant 0.000000e+00 : f32
    %112 = vector.broadcast %cst_44 : f32 to vector<8x10xf32>
    %113 = arith.select %89, %111, %112 : vector<8x10xi1>, vector<8x10xf32>
    %cst_45 = arith.constant dense<0.000000e+00> : vector<8xf32>
    %114 = vector.multi_reduction <add>, %113, %cst_45 [1] : vector<8x10xf32> to vector<8xf32>
    %115 = vector.shape_cast %114 : vector<8xf32> to vector<8x1xf32>
    %cst_46 = arith.constant 0.000000e+00 : f32
    %116 = vector.broadcast %cst_46 : f32 to vector<8x10xf32>
    %117 = arith.select %82, %111, %116 : vector<8x10xi1>, vector<8x10xf32>
    %cst_47 = arith.constant dense<0.000000e+00> : vector<8xf32>
    %118 = vector.multi_reduction <add>, %117, %cst_47 [1] : vector<8x10xf32> to vector<8xf32>
    %119 = vector.shape_cast %118 : vector<8xf32> to vector<8x1xf32>
    %cst_48 = arith.constant 0.000000e+00 : f32
    %120 = vector.broadcast %cst_48 : f32 to vector<8x10xf32>
    %121 = arith.select %87, %111, %120 : vector<8x10xi1>, vector<8x10xf32>
    %cst_49 = arith.constant dense<0.000000e+00> : vector<8xf32>
    %122 = vector.multi_reduction <add>, %121, %cst_49 [1] : vector<8x10xf32> to vector<8xf32>
    %123 = vector.shape_cast %122 : vector<8xf32> to vector<8x1xf32>
    %124 = tpu.reciprocal %115 : vector<8x1xf32> -> vector<8x1xf32>
    %125 = tpu.reciprocal %119 : vector<8x1xf32> -> vector<8x1xf32>
    %126 = tpu.reciprocal %123 : vector<8x1xf32> -> vector<8x1xf32>
    %127 = vector.extract_strided_slice %111 {offsets = [0, 8], sizes = [8, 1], strides = [1, 1]} : vector<8x10xf32> to vector<8x1xf32>
    %128 = arith.mulf %127, %124 : vector<8x1xf32>
    %129 = vector.extract_strided_slice %111 {offsets = [0, 9], sizes = [8, 1], strides = [1, 1]} : vector<8x10xf32> to vector<8x1xf32>
    %130 = arith.mulf %129, %124 : vector<8x1xf32>
    %131 = arith.mulf %125, %128 : vector<8x1xf32>
    %132 = arith.mulf %126, %130 : vector<8x1xf32>
    %133 = vector.shape_cast %132 : vector<8x1xf32> to vector<8x1xf32>
    %134 = vector.broadcast %133 : vector<8x1xf32> to vector<8x10xf32>
    %135 = vector.shape_cast %124 : vector<8x1xf32> to vector<8x1xf32>
    %136 = vector.broadcast %135 : vector<8x1xf32> to vector<8x10xf32>
    %137 = arith.select %87, %134, %136 : vector<8x10xi1>, vector<8x10xf32>
    %138 = vector.shape_cast %131 : vector<8x1xf32> to vector<8x1xf32>
    %139 = vector.broadcast %138 : vector<8x1xf32> to vector<8x10xf32>
    %140 = arith.select %82, %139, %137 : vector<8x10xi1>, vector<8x10xf32>
    %141 = arith.mulf %111, %140 : vector<8x10xf32>
    %142 = vector.extract_strided_slice %141 {offsets = [0, 0], sizes = [8, 8], strides = [1, 1]} : vector<8x10xf32> to vector<8x8xf32>
    %c0_50 = arith.constant 0 : index
    %c0_51 = arith.constant 0 : index
    %143 = vector.load %arg12[%c0_50, %c0_51] : memref<8x8xf32, #tpu.memory_space<vmem>>, vector<8x8xf32>
    tpu.vector_store %arg12[%c0_50, %c0_51], %142 {strides = array<i32>} : memref<8x8xf32, #tpu.memory_space<vmem>>, vector<8x8xf32>,
    return
  }
  func.func @transform_0(%arg0: i32) -> (i32, i32) {
    %c0_i32 = arith.constant 0 : i32
    %c0_i32_0 = arith.constant 0 : i32
    return %arg0, %c0_i32 : i32, i32
  }
  func.func @transform_1(%arg0: i32) -> (i32, i32) {
    %c0_i32 = arith.constant 0 : i32
    %c0_i32_0 = arith.constant 0 : i32
    %c0_i32_1 = arith.constant 0 : i32
    return %c0_i32, %c0_i32_0 : i32, i32
  }
  func.func @transform_2(%arg0: i32) -> (i32, i32) {
    %c0_i32 = arith.constant 0 : i32
    %c0_i32_0 = arith.constant 0 : i32
    %c0_i32_1 = arith.constant 0 : i32
    return %c0_i32, %c0_i32_0 : i32, i32
  }
  func.func @transform_3(%arg0: i32) -> (i32, i32) {
    %c0_i32 = arith.constant 0 : i32
    %c0_i32_0 = arith.constant 0 : i32
    %c0_i32_1 = arith.constant 0 : i32
    return %c0_i32, %c0_i32_0 : i32, i32
  }
  func.func @transform_4(%arg0: i32) -> (i32, i32) {
    %c0_i32 = arith.constant 0 : i32
    %c0_i32_0 = arith.constant 0 : i32
    %c0_i32_1 = arith.constant 0 : i32
    return %c0_i32, %c0_i32_0 : i32, i32
  }
  func.func @transform_5(%arg0: i32) -> (i32, i32) {
    %c0_i32 = arith.constant 0 : i32
    %c0_i32_0 = arith.constant 0 : i32
    %c0_i32_1 = arith.constant 0 : i32
    return %c0_i32, %c0_i32_0 : i32, i32
  }
  func.func @transform_6(%arg0: i32) -> (i32, i32) {
    %c0_i32 = arith.constant 0 : i32
    %c0_i32_0 = arith.constant 0 : i32
    %c0_i32_1 = arith.constant 0 : i32
    return %c0_i32, %c0_i32_0 : i32, i32
  }
  func.func @transform_7(%arg0: i32) -> (i32, i32) {
    %c0_i32 = arith.constant 0 : i32
    %c0_i32_0 = arith.constant 0 : i32
    %c0_i32_1 = arith.constant 0 : i32
    return %c0_i32, %c0_i32_0 : i32, i32
  }
  func.func @transform_8(%arg0: i32) -> (i32, i32) {
    %c0_i32 = arith.constant 0 : i32
    %c0_i32_0 = arith.constant 0 : i32
    %c0_i32_1 = arith.constant 0 : i32
    return %c0_i32, %c0_i32_0 : i32, i32
  }
  func.func @transform_9(%arg0: i32) -> (i32, i32) {
    %c0_i32 = arith.constant 0 : i32
    %c0_i32_0 = arith.constant 0 : i32
    %c0_i32_1 = arith.constant 0 : i32
    return %c0_i32, %c0_i32_0 : i32, i32
  }
  func.func @transform_10(%arg0: i32) -> (i32, i32) {
    %c0_i32 = arith.constant 0 : i32
    %c0_i32_0 = arith.constant 0 : i32
    %c0_i32_1 = arith.constant 0 : i32
    return %c0_i32, %c0_i32_0 : i32, i32
  }
  func.func @transform_11(%arg0: i32) -> (i32, i32) {
    %c0_i32 = arith.constant 0 : i32
    %c0_i32_0 = arith.constant 0 : i32
    return %arg0, %c0_i32 : i32, i32
  }
}

</mosaic_0001>

<bundles_post_ra>
// kernel: tpu_custom_call.1
= control target key start
LH: loop header
LB: loop body
LE: loop exit
PB: predicated region body
PF: predicated region fallthrough
CT: control target
= control target key end

     0   :  { %16 = vsyncpa [#allocation3], 0  ;;  %v457_v1 = vmov 0.0   ;;  %vm458_vm0 = vmmov 0   ;;  %vm65_vm1 = vcmask 261120   ;;  %vm111_vm2 = vcmask 130048   ;;  %s616_s0 = inlined_call_operand.vmem [shape: f32[2,32], index: 0, kind: input, shape index: {}]   ;;  %s617_s1 = inlined_call_operand.vmem [shape: bf16[32,16], index: 1, kind: input, shape index: {}]   ;;  %s618_s2 = inlined_call_operand.vmem [shape: f32[1,16], index: 2, kind: input, shape index: {}]   ;;  %s619_s3 = inlined_call_operand.vmem [shape: f32[1,16], index: 3, kind: input, shape index: {}]   ;;  %s620_s4 = inlined_call_operand.vmem [shape: f32[1,16], index: 4, kind: input, shape index: {}]   ;;  %s621_s5 = inlined_call_operand.vmem [shape: bf16[16,8], index: 5, kind: input, shape index: {}]   ;;  %s622_s6 = inlined_call_operand.vmem [shape: f32[1,8], index: 6, kind: input, shape index: {}]   ;;  %s623_s7 = inlined_call_operand.vmem [shape: f32[1,8], index: 7, kind: input, shape index: {}]   ;;  %s624_s8 = inlined_call_operand.vmem [shape: f32[1,8], index: 8, kind: input, shape index: {}]   ;;  %s625_s9 = inlined_call_operand.vmem [shape: bf16[8,10], index: 9, kind: input, shape index: {}]   ;;  %s626_s10 = inlined_call_operand.vmem [shape: f32[1,10], index: 10, kind: input, shape index: {}]   ;;  %s627_s11 = inlined_call_operand.hbm [shape: f32[2,8], index: 11, kind: output, shape index: {}]  }
   0x1   :  { %v418_v0 = vld [vmem:[%s617_s1 + $0x8] sm:$0xff]   ;;  %387 = vmatprep.subr.bf16.mxu0 %v457_v1  ;;  %395 = vmatprep.subr.bf16.mxu1 %v457_v1  ;;  %v419_v2 = vld [vmem:[%s617_s1] sm:$0xff]   ;;  %vm206_vm3 = vcmask 64512   ;;  %vm247_vm4 = vcmask 1043456   ;;  %v291_v57 = vlaneseq  ;;  %vm459_vm12 = vmmov 1  }
   0x2   :  { %388 = vmatpush3.bf16.msra.mxu0 %v418_v0  ;;  %v40_v3 = vld [vmem:[%s616_s0] sm:$0xff]  ;;  %391 = vmatprep.mubr.msk.bf16.mxu0 %vm458_vm0, %v457_v1  ;;  %vm302_vm14 = vcmask 80896  }
   0x3   :  { %389 = vmatprep.subr.bf16.mxu0 %v457_v1  ;;  %397 = vmatprep.mubr.msk.bf16.mxu1 %vm458_vm0, %v457_v1  ;;  %v41_v4 = vpack.c.bf16 %v40_v3, %v40_v3  ;;  %v367_v5 = vld [vmem:[%s618_s2] ss:$0 sm:$0xff]  ;;  %v292_v58 = vand.u32 127, %v291_v57 }
   0x4   :  { %v420_v17 = vld [vmem:[%s621_s5] sm:$0xff]  }
   0x5   :  { %396 = vmatpush3.bf16.msra.mxu1 %v420_v17  ;;  %v371_v22 = vld [vmem:[%s619_s3] ss:$0 sm:$0xff]  ;;  %vm296_vm5 = vcmp.ge.s32.totalorder %v292_v58, 4  ;;  %vm297_vm6 = vcmp.le.s32.totalorder %v292_v58, 6  ;;  %vm293_vm7 = vcmp.ge.s32.totalorder %v292_v58, 1  ;;  %vm294_vm8 = vcmp.le.s32.totalorder %v292_v58, 3 }
   0x6   :  { %390 = vmatpush3.bf16.msra.mxu0 %v419_v2  ;;  %401 = vmatprep.subr.bf16.mxu1 %v457_v1  ;;  %v372_v24 = vld [vmem:[%s620_s4] ss:$0 sm:$0xff]  ;;  %vm567_vm9 = vmand %vm296_vm5, %vm297_vm6 }
   0x7   :  { %v373_v33 = vld [vmem:[%s622_s6] ss:$0 sm:$0xff]  ;;  %vm571_vm10 = vmand %vm293_vm7, %vm294_vm8 }
   0x8   :  { %v236_v45 = vld [vmem:[%s625_s9] sm:$0xf]  ;;  %vm299_vm11 = vmor %vm571_vm10, %vm567_vm9 }
   0x9   :  { %392 = vmatmul.mubr.msk.bf16.vlgmr.msra.gmra.mxu0 %vm65_vm1, %v41_v4  ;;  %v249_v46 = vsel %vm247_vm4, %v236_v45, 0  ;;  %v376_v51 = vld [vmem:[%s623_s7] ss:$0 sm:$0xff]  ;;  %vm582_vm13 = vmxor %vm299_vm11, %vm459_vm12 }
   0xa   :  { %v377_v53 = vld [vmem:[%s624_s8] ss:$0 sm:$0xff] }
   0xb   :  { %v378_v61 = vld [vmem:[%s626_s10] ss:$0 sm:$0xff] }
  0xc9   :  { %v103_v6 = vpop.f32.mrf.mxu0 }
  0xca   :  { %v104_v7 = vadd.f32 %v367_v5, %v103_v6 }
  0xcb   :  { %v393_v8 = vpop.f32.mrf.mxu0 }
  0xcc   :  { %v112_v9 = vsel %vm111_vm2, %v104_v7, 0.0 }
  0xcd   :  { %113 = vadd.xlane.f32.xlu0 %v112_v9  ;;  %v106_v10 = vpop.f32.mrf.mxu0 }
  0xcf   :  { %v394_v11 = vpop.f32.mrf.mxu0 }
 0x156   :  { %v114_v12 = vpop.xlane.xlu0 %113 }
 0x157   :  { %v116_v13 = vmul.f32 0.0625, %v114_v12 }
 0x159   :  { %v117_v14 = vsub.f32 %v104_v7, %v116_v13 }
 0x15b   :  { %v118_v15 = vmul.f32 %v117_v14, %v117_v14 }
 0x15d   :  { %v119_v16 = vsel %vm111_vm2, %v118_v15, 0.0 }
 0x15e   :  { %120 = vadd.xlane.f32.xlu0 %v119_v16 }
 0x1e7   :  { %v121_v18 = vpop.xlane.xlu0 %120 }
 0x1e8   :  { %v122_v19 = vmul.f32 0.0625, %v121_v18 }
 0x1ea   :  { %v123_v20 = vadd.f32 1e-05, %v122_v19 }
 0x1ec   :  { %421 = vrsqrt.f32 %v123_v20 }
 0x1f9   :  { %v422_v21 = vpop.eup %421 }
 0x1fa   :  { %v125_v23 = vmul.f32 %v422_v21, %v117_v14 }
 0x1fc   :  { %v132_v25 = vmul.f32 %v371_v22, %v125_v23 }
 0x1fe   :  { %v139_v26 = vadd.f32 %v372_v24, %v132_v25  ;;  %v460_v24 = vmov 9   ;;  %v461_v25 = vmov 8  }
 0x1ff   :  { %415 = vset.pattern.permute.xlu0 %v460_v24  ;;  %416 = vset.pattern.permute.xlu1 %v461_v25 }
 0x200   :  { %v141_v27 = vmul.f32 0.70710677, %v139_v26  ;;  %v140_v29 = vmul.f32 0.5, %v139_v26 }
 0x202   :  { %423 = verf.f32 %v141_v27 }
 0x20f   :  { %v424_v28 = vpop.eup %423 }
 0x210   :  { %v143_v30 = vadd.f32 1.0, %v424_v28 }
 0x212   :  { %v144_v31 = vmul.f32 %v143_v30, %v140_v29 }
 0x214   :  { %v145_v32 = vpack.c.bf16 %v144_v31, %v144_v31 }
 0x216   :  { %398 = vmatmul.mubr.msk.bf16.vlgmr.msra.gmra.mxu1 %vm111_vm2, %v145_v32 }
 0x217   :  { %403 = vmatprep.mubr.msk.bf16.mxu1 %vm458_vm0, %v457_v1  ;;  %402 = vmatpush3.bf16.msra.mxu1 %v249_v46 }
 0x2d6   :  { %v198_v34 = vpop.f32.mrf.mxu1 }
 0x2d7   :  { %v199_v35 = vadd.f32 %v373_v33, %v198_v34 }
 0x2d8   :  { %v399_v36 = vpop.f32.mrf.mxu1 }
 0x2d9   :  { %v207_v37 = vsel %vm206_vm3, %v199_v35, 0.0 }
 0x2da   :  { %208 = vadd.xlane.f32.xlu1 %v207_v37  ;;  %v201_v38 = vpop.f32.mrf.mxu1 }
 0x2dc   :  { %v400_v39 = vpop.f32.mrf.mxu1 }
 0x363   :  { %v209_v40 = vpop.xlane.xlu1 %208 }
 0x364   :  { %v211_v41 = vmul.f32 0.125, %v209_v40 }
 0x366   :  { %v212_v42 = vsub.f32 %v199_v35, %v211_v41 }
 0x368   :  { %v213_v43 = vmul.f32 %v212_v42, %v212_v42 }
 0x36a   :  { %v214_v44 = vsel %vm206_vm3, %v213_v43, 0.0 }
 0x36b   :  { %215 = vadd.xlane.f32.xlu1 %v214_v44 }
 0x3f4   :  { %v216_v47 = vpop.xlane.xlu1 %215 }
 0x3f5   :  { %v217_v48 = vmul.f32 0.125, %v216_v47 }
 0x3f7   :  { %v218_v49 = vadd.f32 1e-05, %v217_v48 }
 0x3f9   :  { %425 = vrsqrt.f32 %v218_v49 }
 0x406   :  { %v426_v50 = vpop.eup %425 }
 0x407   :  { %v220_v52 = vmul.f32 %v426_v50, %v212_v42 }
 0x409   :  { %v227_v54 = vmul.f32 %v376_v51, %v220_v52 }
 0x40b   :  { %v234_v55 = vadd.f32 %v377_v53, %v227_v54 }
 0x40d   :  { %v235_v56 = vpack.c.bf16 %v234_v55, %v234_v55 }
 0x40f   :  { %404 = vmatmul.mubr.msk.bf16.vlgmr.msra.gmra.mxu1 %vm206_vm3, %v235_v56 }
 0x4cf   :  { %v285_v62 = vpop.f32.mrf.mxu1 }
 0x4d0   :  { %v286_v0 = vadd.f32 %v378_v61, %v285_v62 }
 0x4d1   :  { %v405_v1 = vpop.f32.mrf.mxu1 }
 0x4d2   :  { %v310_v2 = vsel %vm567_vm9, %v286_v0, -1e+30  ;;  %v301_v3 = vsel %vm582_vm13, %v286_v0, -1e+30  ;;  %v306_v7 = vsel %vm571_vm10, %v286_v0, -1e+30 }
 0x4d3   :  { %v288_v4 = vpop.f32.mrf.mxu1  ;;  %v311_v5 = vsel %vm302_vm14, %v310_v2, -inf  ;;  %v303_v6 = vsel %vm302_vm14, %v301_v3, -inf  ;;  %v307_v9 = vsel %vm302_vm14, %v306_v7, -inf }
 0x4d4   :  { %312 = vmax.xlane.f32.xlu1 %v311_v5  ;;  %304 = vmax.xlane.f32.xlu0 %v303_v6 }
 0x4d5   :  { %v406_v8 = vpop.f32.mrf.mxu1 }
 0x4d8   :  { %308 = vmax.xlane.f32.xlu0 %v307_v9 }
 0x55d   :  { %v305_v10 = vpop.xlane.xlu0 %304  ;;  %v313_v11 = vpop.xlane.xlu1 %312 }
 0x55e   :  { %v314_v12 = vsel %vm567_vm9, %v313_v11, %v305_v10 }
 0x561   :  { %v309_v13 = vpop.xlane.xlu0 %308 }
 0x562   :  { %v315_v14 = vsel %vm571_vm10, %v309_v13, %v314_v12 }
 0x563   :  { %v316_v15 = vsub.f32 %v286_v0, %v315_v14 }
 0x565   :  { %v317_v16 = vmul.f32 1.442695, %v316_v15 }
 0x567   :  { %427 = vpow2.f32 %v317_v16 }
 0x574   :  { %v428_v17 = vpop.eup %427 }
 0x575   :  { %v327_v18 = vsel %vm567_vm9, %v428_v17, 0.0  ;;  %v319_v19 = vsel %vm582_vm13, %v428_v17, 0.0  ;;  %v323_v22 = vsel %vm571_vm10, %v428_v17, 0.0 }
 0x576   :  { %v328_v20 = vsel %vm302_vm14, %v327_v18, 0.0  ;;  %v320_v21 = vsel %vm302_vm14, %v319_v19, 0.0  ;;  %v324_v23 = vsel %vm302_vm14, %v323_v22, 0.0 }
 0x577   :  { %329 = vadd.xlane.f32.xlu0 %v328_v20  ;;  %321 = vadd.xlane.f32.xlu1 %v320_v21 }
 0x57b   :  { %325 = vadd.xlane.f32.xlu1 %v324_v23 }
 0x600   :  { %v322_v26 = vpop.xlane.xlu1 %321  ;;  %v330_v27 = vpop.xlane.xlu0 %329 }
 0x601   :  { %429 = vrcp.f32 %v322_v26 }
 0x602   :  { %431 = vrcp.f32 %v330_v27 }
 0x604   :  { %v326_v28 = vpop.xlane.xlu1 %325 }
 0x605   :  { %433 = vrcp.f32 %v326_v28 }
 0x60e   :  { %v430_v29 = vpop.eup %429 }
 0x60f   :  { %v334_v30 = vmul.f32 %v430_v29, %v428_v17  ;;  %v432_v31 = vpop.eup %431 }
 0x611   :  { %v336_v33 = vmul.f32 %v432_v31, %v334_v30 }
 0x612   :  { %v434_v32 = vpop.eup %433 }
 0x613   :  { %v335_v34 = vmul.f32 %v434_v32, %v334_v30  ;;  %339 = vperm.xlu0 %415, %v336_v33  }
 0x615   :  { %345 = vperm.xlu1 %416, %v335_v34  }
 0x617   :  { %417 = vset.pattern.permute.xlu0 %v461_v25 }
 0x68e   :  { %v340_v35 = vpop.permute.xlu0 %339 }
 0x68f   :  { %v342_v36 = vsel %vm567_vm9, %v340_v35, %v430_v29 }
 0x690   :  { %v346_v37 = vpop.permute.xlu1 %345 }
 0x691   :  { %v348_v38 = vsel %vm571_vm10, %v346_v37, %v342_v36 }
 0x692   :  { %v349_v39 = vmul.f32 %v428_v17, %v348_v38 }
 0x694   :  { %350 = vst.msk [vmem:[#allocation2] sm:$0xff] %vm206_vm3, %v349_v39 }
 0x695   :  { %355 = vsyncadd [#allocation3], 96  ;;  %s462_s9 = smov [#allocation2]  }
 0x696   :  { %s356_s10 = sshll.u32 %s462_s9, 4  ;;  %s357_s10 = int_to_ptr.vmem [resolvable:$true] %s356_s10 }
 0x697   :  { %s435_s13 = scalar_lea.vmem %s357_s10, 32  ;;  %s439_s14 = scalar_lea.vmem %s357_s10, 128 }
 0x698   :  { %p436_p0 = scmp.ne.s32.totalorder %s357_s10, %s435_s13  ;;  %p440_p1 = scmp.lt.s32.totalorder %s357_s10, %s357_s10 }
 0x699   :  { %p441_p2 = scmp.lt.s32.totalorder %s439_s14, %s435_s13 }
 0x69b   :  { %p442_p3 = por %p441_p2, %p440_p1 }
 0x69d   :  { %p443_p4 = pnand %p442_p3, %p436_p0 }
 0x69f   :  { %446 = shalt.err (!%p443_p4)
}
 0x6a0   :  { %s463_s15 = smov 32   ;;  %s464_s16 = smov 2  }
 0x6a1   :  { %362 = dma.vmem_to_hbm [thread:$0]  %s357_s10, 32, %s627_s11, [#allocation3], %s463_s15, %s463_s15, %s464_s16  }
 0x6a2   :  { %455 = dma.done.wait [#allocation3], 128  }
 0x6a3   :  { %456 = vsyncadd [#allocation3], 4294967168 }
 0x6a4   :  { %366 = vsyncpa [#allocation3], 1 }

</bundles_post_ra>
